<compile_context>
chip_gen: v7x
topology: tpu7x:2x2x1
jax: 0.10.0
libtpu: 0.0.40
codegen_flags: <defaults>
</compile_context>

<pallas_src>
import jax
import jax.numpy as jnp
from jax.experimental import pallas as pl
from jax.experimental.pallas import tpu as pltpu


def _round_up(v, m):
    return ((v + m - 1) // m) * m


def model_kernel(x_ref, w1_ref, b1_ref, w2_ref, b2_ref, o_ref):
    # x tile arrives in f32 (single HBM read of the original data); cast to
    # bf16 in-register for the MXU — no extra HBM round trip in the wrapper.
    x = x_ref[...].astype(jnp.bfloat16)

    # backbone: Linear(D -> H) + ReLU   (bf16 operands, f32 MXU accumulation)
    h = jnp.dot(x, w1_ref[...], preferred_element_type=jnp.float32)
    h = jnp.maximum(h + b1_ref[...], 0.0)                 # (TM, H) + (1, H)

    # mlp: Linear(H -> C_pad), kept in f32 (tiny; accuracy > speed here)
    logits = jnp.dot(h, w2_ref[...], preferred_element_type=jnp.float32)
    logits = logits + b2_ref[...]   # padded classes carry -1e30 f32 bias -> exp == 0

    # softmax over dim=1 (class axis), numerically stable
    m = jnp.max(logits, axis=1, keepdims=True)
    e = jnp.exp(logits - m)
    denom = jnp.sum(e, axis=1, keepdims=True)
    o_ref[...] = (e * pl.reciprocal(denom, approx=True)).astype(o_ref.dtype)


def prepare_params(w1, b1, w2, b2, *, c_pad=128):
    """One-time parameter preprocessing (hoisted out of the per-call path)."""
    D, H = w1.shape
    C = w2.shape[1]
    C_pad = max(c_pad, _round_up(C, 128))

    w1_b = w1.astype(jnp.bfloat16)                         # dominant resident operand
    b1_r = b1.reshape(1, H).astype(jnp.float32)
    # Lane-dense output: pad class dim to a multiple of 128. Padded columns get
    # zero weights and a large-negative bias so they contribute exactly 0.
    w2_p = jnp.pad(w2.astype(jnp.float32), ((0, 0), (0, C_pad - C)))
    b2_p = jnp.pad(b2.reshape(1, C).astype(jnp.float32),
                   ((0, 0), (0, C_pad - C)), constant_values=-1e30)
    # NOTE: b2_p must remain float32 (bf16 would turn -1e30 into -inf).
    return dict(w1=w1_b, b1=b1_r, w2=w2_p, b2=b2_p,
                D=D, H=H, C=C, C_pad=C_pad)


def model_forward(x_nchw, params, *, tm=None):
    B = x_nchw.shape[0]
    D, H = params["D"], params["H"]
    C, C_pad = params["C"], params["C_pad"]

    # Batch tile sized to the real batch: tiny batches get a tiny tile (no
    # wasted DMA/MXU work), large batches get 512-row tiles (amortizes per-step
    # overhead, keeps the HBM stream long); multiple-of-16 keeps (8,128)/(16,128)
    # tiling constraints satisfied for both the f32 input and bf16 output blocks.
    if tm is None:
        tm = min(512, _round_up(B, 16))
    B_pad = _round_up(B, tm)

    # torch.flatten(x, 1) equivalent; stays f32 (reshape is layout-only),
    # bf16 cast happens inside the kernel.
    x_flat = x_nchw.reshape(B, D)
    if B_pad != B:
        x_flat = jnp.pad(x_flat, ((0, B_pad - B), (0, 0)))

    out = pl.pallas_call(
        model_kernel,
        out_shape=jax.ShapeDtypeStruct((B_pad, C_pad), jnp.bfloat16),
        grid=(B_pad // tm,),
        in_specs=[
            pl.BlockSpec((tm, D), lambda i: (i, 0)),       # x tile (pipelined)
            pl.BlockSpec((D, H), lambda i: (0, 0)),        # w1 (bf16) VMEM-resident
            pl.BlockSpec((1, H), lambda i: (0, 0)),        # b1 VMEM-resident
            pl.BlockSpec((H, C_pad), lambda i: (0, 0)),    # w2 (f32) VMEM-resident
            pl.BlockSpec((1, C_pad), lambda i: (0, 0)),    # b2 (f32) VMEM-resident
        ],
        out_specs=pl.BlockSpec((tm, C_pad), lambda i: (i, 0)),
        compiler_params=pltpu.CompilerParams(
            dimension_semantics=("parallel",),   # shard batch tiles across TCs (v7x)
            vmem_limit_bytes=32 * 1024 * 1024,
        ),
    )(x_flat, params["w1"], params["b1"], params["w2"], params["b2"])

    # Slice off padded rows/classes; tiny (B, C) cast back to f32 for consumers.
    return out[:B, :C].astype(jnp.float32)


def init_linear(key, fan_in, fan_out):
    # Deterministic init mimicking torch.nn.Linear default (uniform +-1/sqrt(fan_in))
    kw, kb = jax.random.split(key)
    bound = 1.0 / (fan_in ** 0.5)
    w = jax.random.uniform(kw, (fan_in, fan_out), jnp.float32, -bound, bound)
    b = jax.random.uniform(kb, (fan_out,), jnp.float32, -bound, bound)
    return w, b


if __name__ == "__main__":
    key = jax.random.PRNGKey(0)
    k_x, k_l1, k_l2 = jax.random.split(key, 3)

    # Small shapes consistent with the module: NCHW input -> backbone -> mlp -> softmax(dim=1)
    B, Cin, Hs, Ws = 2, 4, 16, 16
    D = Cin * Hs * Ws        # 1024 flattened features
    H = 128                  # backbone hidden width
    C = 16                   # mlp output classes (softmax dim=1)

    x = jax.random.normal(k_x, (B, Cin, Hs, Ws), jnp.float32)
    w1, b1 = init_linear(k_l1, D, H)
    w2, b2 = init_linear(k_l2, H, C)

    params = prepare_params(w1, b1, w2, b2)   # one-time preprocessing
    out = model_forward(x, params)
    out = jax.block_until_ready(out)

    # Reference in plain f32 JAX (kernel uses bf16 first matmul, approx
    # reciprocal and bf16 output, so tolerances are loosened accordingly).
    ref_h = jnp.maximum(x.reshape(B, D) @ w1 + b1, 0.0)
    ref_logits = ref_h @ w2 + b2
    ref = jax.nn.softmax(ref_logits, axis=1)

    assert out.shape == (B, C)
    assert jnp.allclose(out, ref, atol=2e-2, rtol=2e-2), float(jnp.max(jnp.abs(out - ref)))
    assert jnp.allclose(jnp.sum(out, axis=1), 1.0, atol=2e-2)

    print("KERNEL_OK")
</pallas_src>

<mosaic_0001>
module attributes {stable_mosaic.version = 11 : i64} {
  func.func @model_kernel(%arg0: i32, %arg1: memref<16x1024xf32, #tpu.memory_space<vmem>>, %arg2: memref<1024x128xbf16, #tpu.memory_space<vmem>>, %arg3: memref<1x128xf32, #tpu.memory_space<vmem>>, %arg4: memref<128x128xf32, #tpu.memory_space<vmem>>, %arg5: memref<1x128xf32, #tpu.memory_space<vmem>>, %arg6: memref<16x128xbf16, #tpu.memory_space<vmem>>) attributes {dimension_semantics = [#tpu.dimension_semantics<parallel>], iteration_bounds = array<i64: 1>, scalar_prefetch = 0 : i64, scratch_operands = 0 : i64, tpu.core_type = #tpu.core_type<tc>, window_params = [{transform_indices = @transform_0, window_bounds = array<i64: 16, 1024>}, {pipeline_mode = #tpu.pipeline_mode<synchronous>, transform_indices = @transform_1, window_bounds = array<i64: 1024, 128>}, {pipeline_mode = #tpu.pipeline_mode<synchronous>, transform_indices = @transform_2, window_bounds = array<i64: 1, 128>}, {pipeline_mode = #tpu.pipeline_mode<synchronous>, transform_indices = @transform_3, window_bounds = array<i64: 128, 128>}, {pipeline_mode = #tpu.pipeline_mode<synchronous>, transform_indices = @transform_4, window_bounds = array<i64: 1, 128>}, {transform_indices = @transform_5, window_bounds = array<i64: 16, 128>}]} {
    %c0 = arith.constant 0 : index
    %c0_0 = arith.constant 0 : index
    %0 = vector.load %arg1[%c0, %c0_0] : memref<16x1024xf32, #tpu.memory_space<vmem>>, vector<16x1024xf32>
    %1 = arith.truncf %0 : vector<16x1024xf32> to vector<16x1024xbf16>
    %c0_1 = arith.constant 0 : index
    %c0_2 = arith.constant 0 : index
    %2 = vector.load %arg2[%c0_1, %c0_2] : memref<1024x128xbf16, #tpu.memory_space<vmem>>, vector<1024x128xbf16>
    %cst = arith.constant dense<0.000000e+00> : vector<16x128xf32>
    %3 = tpu.matmul %1, %2, %cst {dimension_numbers = #tpu.dot_dimension_numbers<[1], [0], [0], [1], [0, 0, 1, 1], [], []>} : vector<16x1024xbf16>, vector<1024x128xbf16>, vector<16x128xf32> -> vector<16x128xf32>
    %c0_3 = arith.constant 0 : index
    %c0_4 = arith.constant 0 : index
    %4 = vector.load %arg3[%c0_3, %c0_4] : memref<1x128xf32, #tpu.memory_space<vmem>>, vector<1x128xf32>
    %5 = vector.broadcast %4 : vector<1x128xf32> to vector<16x128xf32>
    %6 = arith.addf %3, %5 : vector<16x128xf32>
    %cst_5 = arith.constant 0.000000e+00 : f32
    %7 = vector.broadcast %cst_5 : f32 to vector<16x128xf32>
    %8 = arith.maximumf %6, %7 : vector<16x128xf32>
    %c0_6 = arith.constant 0 : index
    %c0_7 = arith.constant 0 : index
    %9 = vector.load %arg4[%c0_6, %c0_7] : memref<128x128xf32, #tpu.memory_space<vmem>>, vector<128x128xf32>
    %cst_8 = arith.constant dense<0.000000e+00> : vector<16x128xf32>
    %10 = tpu.matmul %8, %9, %cst_8 {dimension_numbers = #tpu.dot_dimension_numbers<[1], [0], [0], [1], [0, 0, 1, 1], [], []>} : vector<16x128xf32>, vector<128x128xf32>, vector<16x128xf32> -> vector<16x128xf32>
    %c0_9 = arith.constant 0 : index
    %c0_10 = arith.constant 0 : index
    %11 = vector.load %arg5[%c0_9, %c0_10] : memref<1x128xf32, #tpu.memory_space<vmem>>, vector<1x128xf32>
    %12 = vector.broadcast %11 : vector<1x128xf32> to vector<16x128xf32>
    %13 = arith.addf %10, %12 : vector<16x128xf32>
    %cst_11 = arith.constant dense<0xFF800000> : vector<16xf32>
    %14 = vector.multi_reduction <maximumf>, %13, %cst_11 [1] : vector<16x128xf32> to vector<16xf32>
    %15 = vector.shape_cast %14 : vector<16xf32> to vector<16x1xf32>
    %16 = vector.broadcast %15 : vector<16x1xf32> to vector<16x128xf32>
    %17 = arith.subf %13, %16 : vector<16x128xf32>
    %18 = math.exp %17 : vector<16x128xf32>
    %cst_12 = arith.constant dense<0.000000e+00> : vector<16xf32>
    %19 = vector.multi_reduction <add>, %18, %cst_12 [1] : vector<16x128xf32> to vector<16xf32>
    %20 = vector.shape_cast %19 : vector<16xf32> to vector<16x1xf32>
    %21 = tpu.reciprocal %20 {approx = true} : vector<16x1xf32> -> vector<16x1xf32>
    %22 = vector.broadcast %21 : vector<16x1xf32> to vector<16x128xf32>
    %23 = arith.mulf %18, %22 : vector<16x128xf32>
    %24 = arith.truncf %23 : vector<16x128xf32> to vector<16x128xbf16>
    %c0_13 = arith.constant 0 : index
    %c0_14 = arith.constant 0 : index
    %25 = vector.load %arg6[%c0_13, %c0_14] : memref<16x128xbf16, #tpu.memory_space<vmem>>, vector<16x128xbf16>
    tpu.vector_store %arg6[%c0_13, %c0_14], %24 {strides = array<i32>} : memref<16x128xbf16, #tpu.memory_space<vmem>>, vector<16x128xbf16>,
    return
  }
  func.func @transform_0(%arg0: i32) -> (i32, i32) {
    %c0_i32 = arith.constant 0 : i32
    %c0_i32_0 = arith.constant 0 : i32
    return %arg0, %c0_i32 : i32, i32
  }
  func.func @transform_1(%arg0: i32) -> (i32, i32) {
    %c0_i32 = arith.constant 0 : i32
    %c0_i32_0 = arith.constant 0 : i32
    %c0_i32_1 = arith.constant 0 : i32
    return %c0_i32, %c0_i32_0 : i32, i32
  }
  func.func @transform_2(%arg0: i32) -> (i32, i32) {
    %c0_i32 = arith.constant 0 : i32
    %c0_i32_0 = arith.constant 0 : i32
    %c0_i32_1 = arith.constant 0 : i32
    return %c0_i32, %c0_i32_0 : i32, i32
  }
  func.func @transform_3(%arg0: i32) -> (i32, i32) {
    %c0_i32 = arith.constant 0 : i32
    %c0_i32_0 = arith.constant 0 : i32
    %c0_i32_1 = arith.constant 0 : i32
    return %c0_i32, %c0_i32_0 : i32, i32
  }
  func.func @transform_4(%arg0: i32) -> (i32, i32) {
    %c0_i32 = arith.constant 0 : i32
    %c0_i32_0 = arith.constant 0 : i32
    %c0_i32_1 = arith.constant 0 : i32
    return %c0_i32, %c0_i32_0 : i32, i32
  }
  func.func @transform_5(%arg0: i32) -> (i32, i32) {
    %c0_i32 = arith.constant 0 : i32
    %c0_i32_0 = arith.constant 0 : i32
    return %arg0, %c0_i32 : i32, i32
  }
}

</mosaic_0001>

<bundles_post_ra>
// kernel: tpu_custom_call.1
= control target key start
LH: loop header
LB: loop body
LE: loop exit
PB: predicated region body
PF: predicated region fallthrough
CT: control target
= control target key end

     0   :  { %10 = vsyncpa [#allocation3], 0  ;;  %s1439_s0 = inlined_call_operand.hbm [shape: f32[16,1024], index: 0, kind: input, shape index: {}]   ;;  %s1440_s1 = inlined_call_operand.hbm [shape: bf16[1024,128], index: 1, kind: input, shape index: {}]   ;;  %s1441_s2 = inlined_call_operand.vmem [shape: f32[1,128], index: 2, kind: input, shape index: {}]   ;;  %s1442_s3 = inlined_call_operand.hbm [shape: f32[128,128], index: 3, kind: input, shape index: {}]   ;;  %s1443_s4 = inlined_call_operand.vmem [shape: f32[1,128], index: 4, kind: input, shape index: {}]   ;;  %s1444_s5 = inlined_call_operand.hbm [shape: bf16[16,128], index: 5, kind: output, shape index: {}]  }
   0x1   :  { %11 = vsyncpa [#allocation6], 0 }
   0x2   :  { %12 = vsyncpa [#allocation4], 0  ;;  %s1339_s18 = smov [#allocation5]   ;;  %s1245_s22 = scalar_lea.hbm %s1440_s1, 8192 }
   0x3   :  { %s30_s19 = sshll.u32 %s1339_s18, 4  ;;  %p1246_p0 = scmp.ne.s32.totalorder %s1440_s1, %s1245_s22  ;;  %s31_s19 = int_to_ptr.vmem [resolvable:$true] %s30_s19 }
   0x4   :  { %p1249_p1 = scmp.lt.u32.totalorder %s1245_s22, %s1440_s1 }
   0x6   :  { %p1251_p2 = pnand %p1249_p1, %p1246_p0 }
   0x8   :  { %1254 = shalt.err (!%p1251_p2)
}
   0x9   :  { %s1255_s27 = scalar_lea.vmem %s31_s19, 8192  ;;  %p1260_p4 = scmp.lt.s32.totalorder %s31_s19, %s31_s19 }
   0xa   :  { %p1256_p3 = scmp.ne.s32.totalorder %s31_s19, %s1255_s27  ;;  %p1261_p5 = scmp.lt.s32.totalorder %s1255_s27, %s1255_s27 }
   0xc   :  { %p1262_p6 = por %p1261_p5, %p1260_p4 }
   0xe   :  { %p1263_p7 = pnand %p1262_p6, %p1256_p3 }
  0x10   :  { %1266 = shalt.err (!%p1263_p7)
}
  0x11   :  { %s1340_s28 = smov 64   ;;  %s1341_s29 = smov 4  }
  0x12   :  { %36 = dma.hbm_to_vmem [thread:$0]  %s1440_s1, 8192, %s31_s19, [#allocation6], %s1340_s28, %s1340_s28, %s1341_s29  }
  0x13   :  { %s1342_s7 = smov [#allocation2]   ;;  %s1267_s11 = scalar_lea.hbm %s1439_s0, 2048 }
  0x14   :  { %s18_s8 = sshll.u32 %s1342_s7, 4  ;;  %p1268_p8 = scmp.ne.s32.totalorder %s1439_s0, %s1267_s11  ;;  %s19_s8 = int_to_ptr.vmem [resolvable:$true] %s18_s8 }
  0x15   :  { %p1271_p9 = scmp.lt.u32.totalorder %s1267_s11, %s1439_s0 }
  0x17   :  { %p1273_p10 = pnand %p1271_p9, %p1268_p8 }
  0x19   :  { %1276 = shalt.err (!%p1273_p10)
}
  0x1a   :  { %s1277_s16 = scalar_lea.vmem %s19_s8, 2048  ;;  %p1282_p12 = scmp.lt.s32.totalorder %s19_s8, %s19_s8 }
  0x1b   :  { %p1278_p11 = scmp.ne.s32.totalorder %s19_s8, %s1277_s16  ;;  %p1283_p13 = scmp.lt.s32.totalorder %s1277_s16, %s1277_s16 }
  0x1d   :  { %p1284_p0 = por %p1283_p13, %p1282_p12 }
  0x1f   :  { %p1285_p1 = pnand %p1284_p0, %p1278_p11 }
  0x21   :  { %1288 = shalt.err (!%p1285_p1)
}
  0x22   :  { %s1343_s1 = smov 1024   ;;  %s1344_s19 = smov [#allocation7]  }
  0x23   :  { %24 = dma.hbm_to_vmem [thread:$0]  %s1439_s0, 2048, %s19_s8, [#allocation3], %s1343_s1, %s1343_s1, %s1340_s28  }
  0x24   :  { %s44_s20 = sshll.u32 %s1344_s19, 4  ;;  %s1289_s23 = scalar_lea.hbm %s1442_s3, 2048  ;;  %s45_s20 = int_to_ptr.vmem [resolvable:$true] %s44_s20 }
  0x25   :  { %p1290_p2 = scmp.ne.s32.totalorder %s1442_s3, %s1289_s23  ;;  %p1293_p3 = scmp.lt.u32.totalorder %s1289_s23, %s1442_s3 }
  0x27   :  { %p1295_p4 = pnand %p1293_p3, %p1290_p2 }
  0x29   :  { %1298 = shalt.err (!%p1295_p4)
}
  0x2a   :  { %s1299_s30 = scalar_lea.vmem %s45_s20, 2048  ;;  %p1304_p6 = scmp.lt.s32.totalorder %s45_s20, %s45_s20 }
  0x2b   :  { %p1300_p5 = scmp.ne.s32.totalorder %s45_s20, %s1299_s30  ;;  %p1305_p7 = scmp.lt.s32.totalorder %s1299_s30, %s1299_s30 }
  0x2d   :  { %p1306_p8 = por %p1305_p7, %p1304_p6 }
  0x2f   :  { %p1307_p9 = pnand %p1306_p8, %p1300_p5 }
  0x31   :  { %1310 = shalt.err (!%p1307_p9)
}
  0x32   :  { %s1345_s0 = smov 128   ;;  %s1346_s6 = smov 8  }
  0x33   :  { %50 = dma.hbm_to_vmem [thread:$0]  %s1442_s3, 2048, %s45_s20, [#allocation6], %s1345_s0, %s1345_s0, %s1346_s6  }
  0x34   :  { %1333 = dma.done.wait [#allocation3], 2048  }
  0x35   :  { %1334 = vsyncadd [#allocation3], 4294965248 }
  0x36   :  { %1335 = dma.done.wait [#allocation6], 10240  }
  0x37   :  { %1336 = vsyncadd [#allocation6], 4294957056  ;;  %v1173_v0 = vld [vmem:[#allocation5 + $0x40] sm:$0xff]   ;;  %v1177_v4 = vld [vmem:[#allocation5 + $0x48] sm:$0xff]  }
  0x38   :  { %v1174_v1 = vld [vmem:[#allocation5 + $0xc0] sm:$0xff]   ;;  %991 = vmatprep.subr.bf16.mxu0 %v1173_v0  ;;  %v1178_v5 = vld [vmem:[#allocation5 + $0xc8] sm:$0xff]   ;;  %v1181_v8 = vld [vmem:[#allocation5 + $0x50] sm:$0xff]  }
  0x39   :  { %v1175_v2 = vld [vmem:[#allocation5] sm:$0xff]   ;;  %1013 = vmatprep.subr.bf16.mxu1 %v1174_v1  ;;  %v1179_v6 = vld [vmem:[#allocation5 + $0x8] sm:$0xff]   ;;  %v1182_v9 = vld [vmem:[#allocation5 + $0xd0] sm:$0xff]  }
  0x3a   :  { %v1176_v3 = vld [vmem:[#allocation5 + $0x80] sm:$0xff]   ;;  %992 = vmatpush3.bf16.msra.mxu0 %v1175_v2  ;;  %v1180_v7 = vld [vmem:[#allocation5 + $0x88] sm:$0xff]   ;;  %v1183_v10 = vld [vmem:[#allocation5 + $0x10] sm:$0xff]  }
  0x3b   :  { %1014 = vmatpush3.bf16.msra.mxu1 %v1176_v3  ;;  %993 = vmatprep.subr.bf16.mxu0 %v1177_v4  ;;  %v1184_v11 = vld [vmem:[#allocation5 + $0x90] sm:$0xff]   ;;  %v1185_v12 = vld [vmem:[#allocation5 + $0x58] sm:$0xff]   ;;  %v1189_v16 = vld [vmem:[#allocation5 + $0x60] sm:$0xff]  }
  0x3c   :  { %1015 = vmatprep.subr.bf16.mxu1 %v1178_v5  ;;  %v1186_v13 = vld [vmem:[#allocation5 + $0xd8] sm:$0xff]   ;;  %v1190_v17 = vld [vmem:[#allocation5 + $0xe0] sm:$0xff]   ;;  %v1193_v20 = vld [vmem:[#allocation5 + $0x68] sm:$0xff]  }
  0x3d   :  { %v1187_v14 = vld [vmem:[#allocation5 + $0x18] sm:$0xff]   ;;  %v1191_v18 = vld [vmem:[#allocation5 + $0x20] sm:$0xff]   ;;  %v1194_v21 = vld [vmem:[#allocation5 + $0xe8] sm:$0xff]  }
  0x3e   :  { %994 = vmatpush3.bf16.msra.mxu0 %v1179_v6  ;;  %v1188_v15 = vld [vmem:[#allocation5 + $0x98] sm:$0xff]   ;;  %v1192_v19 = vld [vmem:[#allocation5 + $0xa0] sm:$0xff]   ;;  %v1195_v22 = vld [vmem:[#allocation5 + $0x28] sm:$0xff]  }
  0x3f   :  { %1016 = vmatpush3.bf16.msra.mxu1 %v1180_v7  ;;  %995 = vmatprep.subr.bf16.mxu0 %v1181_v8  ;;  %v1196_v23 = vld [vmem:[#allocation5 + $0xa8] sm:$0xff]   ;;  %v1197_v24 = vld [vmem:[#allocation5 + $0x70] sm:$0xff]   ;;  %v1201_v28 = vld [vmem:[#allocation5 + $0x78] sm:$0xff]  }
  0x40   :  { %1017 = vmatprep.subr.bf16.mxu1 %v1182_v9  ;;  %v1198_v25 = vld [vmem:[#allocation5 + $0xf0] sm:$0xff]   ;;  %v1202_v29 = vld [vmem:[#allocation5 + $0xf8] sm:$0xff]   ;;  %v64_v32 = vld [vmem:[#allocation2 + $0x8] sm:$0xff] }
  0x41   :  { %v1199_v26 = vld [vmem:[#allocation5 + $0x30] sm:$0xff]   ;;  %v1203_v30 = vld [vmem:[#allocation5 + $0x38] sm:$0xff]   ;;  %v72_v33 = vld [vmem:[#allocation2 + $0x48] sm:$0xff] }
  0x42   :  { %996 = vmatpush3.bf16.msra.mxu0 %v1183_v10  ;;  %v1200_v27 = vld [vmem:[#allocation5 + $0xb0] sm:$0xff]   ;;  %v1204_v31 = vld [vmem:[#allocation5 + $0xb8] sm:$0xff]   ;;  %v80_v35 = vpack.c.bf16 %v72_v33, %v64_v32  ;;  %v63_v37 = vld [vmem:[#allocation2] sm:$0xff] }
  0x43   :  { %1018 = vmatpush3.bf16.msra.mxu1 %v1184_v11  ;;  %997 = vmatprep.subr.bf16.mxu0 %v1185_v12  ;;  %v66_v34 = vld [vmem:[#allocation2 + $0x18] sm:$0xff]  ;;  %v71_v38 = vld [vmem:[#allocation2 + $0x40] sm:$0xff]  ;;  %v65_v41 = vld [vmem:[#allocation2 + $0x10] sm:$0xff] }
  0x44   :  { %1019 = vmatprep.subr.bf16.mxu1 %v1186_v13  ;;  %v74_v36 = vld [vmem:[#allocation2 + $0x58] sm:$0xff]  ;;  %v79_v40 = vpack.c.bf16 %v71_v38, %v63_v37  ;;  %v73_v42 = vld [vmem:[#allocation2 + $0x50] sm:$0xff]  ;;  %638 = vmatprep.mubr.bf16.mxu0 %v80_v35  ;;  %v1205_v44 = vld [vmem:[#allocation5 + $0x140] sm:$0xff]  }
  0x45   :  { %v82_v39 = vpack.c.bf16 %v74_v36, %v66_v34  ;;  %v81_v43 = vpack.c.bf16 %v73_v42, %v65_v41  ;;  %v1206_v45 = vld [vmem:[#allocation5 + $0x1c0] sm:$0xff]   ;;  %v1209_v48 = vld [vmem:[#allocation5 + $0x148] sm:$0xff]   ;;  %v1213_v52 = vld [vmem:[#allocation5 + $0x150] sm:$0xff]  }
  0x46   :  { %998 = vmatpush3.bf16.msra.mxu0 %v1187_v14  ;;  %v1207_v46 = vld [vmem:[#allocation5 + $0x100] sm:$0xff]   ;;  %v1210_v49 = vld [vmem:[#allocation5 + $0x1c8] sm:$0xff]   ;;  %v1214_v53 = vld [vmem:[#allocation5 + $0x1d0] sm:$0xff]  }
  0x47   :  { %1020 = vmatpush3.bf16.msra.mxu1 %v1188_v15  ;;  %999 = vmatprep.subr.bf16.mxu0 %v1189_v16  ;;  %v1208_v47 = vld [vmem:[#allocation5 + $0x180] sm:$0xff]   ;;  %v1211_v50 = vld [vmem:[#allocation5 + $0x108] sm:$0xff]   ;;  %v1215_v54 = vld [vmem:[#allocation5 + $0x110] sm:$0xff]  }
  0x48   :  { %1021 = vmatprep.subr.bf16.mxu1 %v1190_v17  ;;  %679 = vmatprep.mubr.bf16.mxu1 %v82_v39  ;;  %v1212_v51 = vld [vmem:[#allocation5 + $0x188] sm:$0xff]   ;;  %v1216_v55 = vld [vmem:[#allocation5 + $0x190] sm:$0xff]   ;;  %v1217_v56 = vld [vmem:[#allocation5 + $0x158] sm:$0xff]  }
  0x49   :  { %v1218_v57 = vld [vmem:[#allocation5 + $0x1d8] sm:$0xff]   ;;  %v1221_v60 = vld [vmem:[#allocation5 + $0x160] sm:$0xff]   ;;  %v1225_v0 = vld [vmem:[#allocation5 + $0x168] sm:$0xff]  }
  0x4a   :  { %1000 = vmatpush3.bf16.msra.mxu0 %v1191_v18  ;;  %v1219_v58 = vld [vmem:[#allocation5 + $0x118] sm:$0xff]   ;;  %v1222_v61 = vld [vmem:[#allocation5 + $0x1e0] sm:$0xff]   ;;  %v1226_v1 = vld [vmem:[#allocation5 + $0x1e8] sm:$0xff]  }
  0x4b   :  { %1022 = vmatpush3.bf16.msra.mxu1 %v1192_v19  ;;  %1001 = vmatprep.subr.bf16.mxu0 %v1193_v20  ;;  %v1220_v59 = vld [vmem:[#allocation5 + $0x198] sm:$0xff]   ;;  %v1223_v62 = vld [vmem:[#allocation5 + $0x120] sm:$0xff]   ;;  %v1227_v2 = vld [vmem:[#allocation5 + $0x128] sm:$0xff]  }
  0x4c   :  { %1023 = vmatprep.subr.bf16.mxu1 %v1194_v21  ;;  %v1224_v63 = vld [vmem:[#allocation5 + $0x1a0] sm:$0xff]   ;;  %v1228_v3 = vld [vmem:[#allocation5 + $0x1a8] sm:$0xff]   ;;  %v1229_v4 = vld [vmem:[#allocation5 + $0x170] sm:$0xff]  }
  0x4d   :  { %v1230_v5 = vld [vmem:[#allocation5 + $0x1f0] sm:$0xff]   ;;  %v1233_v8 = vld [vmem:[#allocation5 + $0x178] sm:$0xff]   ;;  %v68_v12 = vld [vmem:[#allocation2 + $0x28] sm:$0xff] }
  0x4e   :  { %1002 = vmatpush3.bf16.msra.mxu0 %v1195_v22  ;;  %v1231_v6 = vld [vmem:[#allocation5 + $0x130] sm:$0xff]   ;;  %v1234_v9 = vld [vmem:[#allocation5 + $0x1f8] sm:$0xff]   ;;  %v76_v13 = vld [vmem:[#allocation2 + $0x68] sm:$0xff] }
  0x4f   :  { %1024 = vmatpush3.bf16.msra.mxu1 %v1196_v23  ;;  %1003 = vmatprep.subr.bf16.mxu0 %v1197_v24  ;;  %v1232_v7 = vld [vmem:[#allocation5 + $0x1b0] sm:$0xff]   ;;  %v1235_v10 = vld [vmem:[#allocation5 + $0x138] sm:$0xff]   ;;  %v84_v16 = vpack.c.bf16 %v76_v13, %v68_v12  ;;  %v67_v18 = vld [vmem:[#allocation2 + $0x20] sm:$0xff] }
  0x50   :  { %1025 = vmatprep.subr.bf16.mxu1 %v1198_v25  ;;  %v1236_v11 = vld [vmem:[#allocation5 + $0x1b8] sm:$0xff]   ;;  %v75_v19 = vld [vmem:[#allocation2 + $0x60] sm:$0xff]  ;;  %v69_v20 = vld [vmem:[#allocation2 + $0x30] sm:$0xff] }
  0x51   :  { %v70_v14 = vld [vmem:[#allocation2 + $0x38] sm:$0xff]  ;;  %v83_v21 = vpack.c.bf16 %v75_v19, %v67_v18  ;;  %v77_v22 = vld [vmem:[#allocation2 + $0x70] sm:$0xff]  ;;  %v772_v24 = vld [vmem:[#allocation7] sm:$0xff] }
  0x52   :  { %1004 = vmatpush3.bf16.msra.mxu0 %v1199_v26  ;;  %v78_v15 = vld [vmem:[#allocation2 + $0x78] sm:$0xff]  ;;  %v85_v23 = vpack.c.bf16 %v77_v22, %v69_v20  ;;  %v773_v25 = vld [vmem:[#allocation7 + $0x8] sm:$0xff]  ;;  %v774_v26 = vld [vmem:[#allocation7 + $0x10] sm:$0xff] }
  0x53   :  { %1026 = vmatpush3.bf16.msra.mxu1 %v1200_v27  ;;  %1005 = vmatprep.subr.bf16.mxu0 %v1201_v28  ;;  %v86_v17 = vpack.c.bf16 %v78_v15, %v70_v14  ;;  %v1132_v27 = vpack.c.bf16 %v773_v25, %v772_v24  ;;  %v775_v28 = vld [vmem:[#allocation7 + $0x18] sm:$0xff]  ;;  %v778_v33 = vld [vmem:[#allocation7 + $0x30] sm:$0xff]  ;;  %v780_v36 = vld [vmem:[#allocation7 + $0x40] sm:$0xff] }
  0x54   :  { %1027 = vmatprep.subr.bf16.mxu1 %v1202_v29  ;;  %v1136_v29 = vpack.c.bf16 %v775_v28, %v774_v26  ;;  %v779_v34 = vld [vmem:[#allocation7 + $0x38] sm:$0xff]  ;;  %v781_v37 = vld [vmem:[#allocation7 + $0x48] sm:$0xff]  ;;  %v782_v39 = vld [vmem:[#allocation7 + $0x50] sm:$0xff] }
  0x55   :  { %v1144_v35 = vpack.c.bf16 %v779_v34, %v778_v33  ;;  %v1148_v38 = vpack.c.bf16 %v781_v37, %v780_v36  ;;  %v784_v42 = vld [vmem:[#allocation7 + $0x60] sm:$0xff] }
  0x56   :  { %1006 = vmatpush3.bf16.msra.mxu0 %v1203_v30  ;;  %v776_v30 = vld [vmem:[#allocation7 + $0x20] sm:$0xff] }
  0x57   :  { %1028 = vmatpush3.bf16.msra.mxu1 %v1204_v31  ;;  %1035 = vmatprep.subr.bf16.mxu0 %v1205_v44  ;;  %v777_v31 = vld [vmem:[#allocation7 + $0x28] sm:$0xff]  ;;  %v981_v19 = vld [vmem:[%s1443_s4] ss:$0 sm:$0xff]  ;;  %s1347_s4 = smov [#allocation8]  }
  0x58   :  { %1057 = vmatprep.subr.bf16.mxu1 %v1206_v45  ;;  %v1140_v32 = vpack.c.bf16 %v777_v31, %v776_v30  ;;  %v786_v45 = vld [vmem:[#allocation7 + $0x70] sm:$0xff]  ;;  %s903_s11 = sshll.u32 %s1347_s4, 4  ;;  %s904_s11 = int_to_ptr.vmem [resolvable:$true] %s903_s11 }
  0x59   :  { %639 = vmatmul.mubr.bf16.vlgmr.msra.gmra.mrb[0].mxu0 %v79_v40  ;;  %v783_v40 = vld [vmem:[#allocation7 + $0x58] sm:$0xff]  ;;  %s1311_s12 = scalar_lea.vmem %s904_s11, 128  ;;  %p1316_p11 = scmp.lt.s32.totalorder %s904_s11, %s904_s11 }
  0x5a   :  { %680 = vmatmul.mubr.bf16.vlgmr.msra.gmra.mrb[0].mxu1 %v81_v43  ;;  %1036 = vmatpush3.bf16.msra.mxu0 %v1207_v46  ;;  %v1152_v41 = vpack.c.bf16 %v783_v40, %v782_v39  ;;  %v785_v43 = vld [vmem:[#allocation7 + $0x68] sm:$0xff]  ;;  %v787_v46 = vld [vmem:[#allocation7 + $0x78] sm:$0xff]  ;;  %p1312_p10 = scmp.ne.s32.totalorder %s904_s11, %s1311_s12  ;;  %p1317_p12 = scmp.lt.s32.totalorder %s1311_s12, %s1311_s12 }
  0x5b   :  { %1058 = vmatpush3.bf16.msra.mxu1 %v1208_v47  ;;  %1037 = vmatprep.subr.bf16.mxu0 %v1209_v48  ;;  %v1156_v44 = vpack.c.bf16 %v785_v43, %v784_v42  ;;  %v1160_v47 = vpack.c.bf16 %v787_v46, %v786_v45 }
  0x5c   :  { %1059 = vmatprep.subr.bf16.mxu1 %v1210_v49  ;;  %720 = vmatprep.mubr.bf16.mxu0 %v84_v16  ;;  %p1318_p13 = por %p1317_p12, %p1316_p11 }
  0x5d   :  { %761 = vmatprep.mubr.bf16.mxu1 %v86_v17 }
  0x5e   :  { %1038 = vmatpush3.bf16.msra.mxu0 %v1211_v50  ;;  %v916_v50 = vld [vmem:[%s1441_s2] ss:$0 sm:$0xff]  ;;  %p1319_p0 = pnand %p1318_p13, %p1312_p10 }
  0x5f   :  { %1060 = vmatpush3.bf16.msra.mxu1 %v1212_v51  ;;  %1039 = vmatprep.subr.bf16.mxu0 %v1213_v52 }
  0x60   :  { %1061 = vmatprep.subr.bf16.mxu1 %v1214_v53 }
  0x62   :  { %1040 = vmatpush3.bf16.msra.mxu0 %v1215_v54 }
  0x63   :  { %1062 = vmatpush3.bf16.msra.mxu1 %v1216_v55  ;;  %1041 = vmatprep.subr.bf16.mxu0 %v1217_v56 }
  0x64   :  { %1063 = vmatprep.subr.bf16.mxu1 %v1218_v57 }
  0x66   :  { %1042 = vmatpush3.bf16.msra.mxu0 %v1219_v58 }
  0x67   :  { %1064 = vmatpush3.bf16.msra.mxu1 %v1220_v59  ;;  %1043 = vmatprep.subr.bf16.mxu0 %v1221_v60 }
  0x68   :  { %1065 = vmatprep.subr.bf16.mxu1 %v1222_v61 }
  0x6a   :  { %1044 = vmatpush3.bf16.msra.mxu0 %v1223_v62 }
  0x6b   :  { %1066 = vmatpush3.bf16.msra.mxu1 %v1224_v63  ;;  %1045 = vmatprep.subr.bf16.mxu0 %v1225_v0 }
  0x6c   :  { %1067 = vmatprep.subr.bf16.mxu1 %v1226_v1 }
  0x6e   :  { %1046 = vmatpush3.bf16.msra.mxu0 %v1227_v2 }
  0x6f   :  { %1068 = vmatpush3.bf16.msra.mxu1 %v1228_v3  ;;  %1047 = vmatprep.subr.bf16.mxu0 %v1229_v4 }
  0x70   :  { %1069 = vmatprep.subr.bf16.mxu1 %v1230_v5 }
  0x72   :  { %1048 = vmatpush3.bf16.msra.mxu0 %v1231_v6 }
  0x73   :  { %1070 = vmatpush3.bf16.msra.mxu1 %v1232_v7  ;;  %1049 = vmatprep.subr.bf16.mxu0 %v1233_v8 }
  0x74   :  { %1071 = vmatprep.subr.bf16.mxu1 %v1234_v9 }
  0x76   :  { %1050 = vmatpush3.bf16.msra.mxu0 %v1235_v10 }
  0x77   :  { %1072 = vmatpush3.bf16.msra.mxu1 %v1236_v11  ;;  %1133 = vmatprep.subr.bf16.mxu0 %v1132_v27 }
  0x79   :  { %721 = vmatmul.mubr.bf16.vlgmr.msra.gmra.mrb[4].mxu0 %v83_v21 }
  0x7a   :  { %762 = vmatmul.mubr.bf16.vlgmr.msra.gmra.mrb[4].mxu1 %v85_v23  ;;  %1135 = vmatpush3.bf16.msra.mxu0 %v1132_v27 }
  0x7b   :  { %1137 = vmatprep.subr.bf16.mxu0 %v1136_v29 }
  0x7e   :  { %1139 = vmatpush3.bf16.msra.mxu0 %v1136_v29 }
  0x7f   :  { %1141 = vmatprep.subr.bf16.mxu0 %v1140_v32 }
  0x82   :  { %1143 = vmatpush3.bf16.msra.mxu0 %v1140_v32 }
  0x83   :  { %1145 = vmatprep.subr.bf16.mxu0 %v1144_v35 }
  0x86   :  { %1147 = vmatpush3.bf16.msra.mxu0 %v1144_v35 }
  0x87   :  { %1149 = vmatprep.subr.bf16.mxu0 %v1148_v38 }
  0x8a   :  { %1151 = vmatpush3.bf16.msra.mxu0 %v1148_v38 }
  0x8b   :  { %1153 = vmatprep.subr.bf16.mxu0 %v1152_v41 }
  0x8e   :  { %1155 = vmatpush3.bf16.msra.mxu0 %v1152_v41 }
  0x8f   :  { %1157 = vmatprep.subr.bf16.mxu0 %v1156_v44 }
  0x92   :  { %1159 = vmatpush3.bf16.msra.mxu0 %v1156_v44 }
  0x93   :  { %1161 = vmatprep.subr.bf16.mxu0 %v1160_v47 }
  0x96   :  { %1163 = vmatpush3.bf16.msra.mxu0 %v1160_v47 }
 0x12c   :  { %v1007_v48 = vpop.f32.mrb[0].mxu0 }
 0x12d   :  { %v1029_v49 = vpop.f32.mrb[0].mxu1  ;;  %v1008_v51 = vpop.f32.mrb[1].mxu0 }
 0x12e   :  { %v1009_v52 = vadd.f32 %v1008_v51, %v1007_v48  ;;  %v1030_v53 = vpop.f32.mrb[1].mxu1  ;;  %v1010_v54 = vpop.f32.mrb[2].mxu0 }
 0x12f   :  { %v1031_v55 = vadd.f32 %v1030_v53, %v1029_v49  ;;  %v1032_v56 = vpop.f32.mrb[2].mxu1  ;;  %v1011_v57 = vpop.f32.mrb[3].mxu0 }
 0x130   :  { %v641_v58 = vadd.f32 %v1009_v52, %v916_v50  ;;  %v1012_v59 = vadd.f32 %v1011_v57, %v1010_v54  ;;  %v1033_v60 = vpop.f32.mrb[3].mxu1 }
 0x131   :  { %v1034_v61 = vadd.f32 %v1033_v60, %v1032_v56 }
 0x132   :  { %v682_v62 = vadd.f32 %v1031_v55, %v641_v58  ;;  %v644_v63 = vadd.f32 %v1012_v59, %v916_v50 }
 0x134   :  { %v685_v0 = vadd.f32 %v1034_v61, %v644_v63 }
 0x14c   :  { %v1051_v1 = vpop.f32.mrb[4].mxu0 }
 0x14d   :  { %v1073_v2 = vpop.f32.mrb[4].mxu1  ;;  %v1052_v3 = vpop.f32.mrb[5].mxu0 }
 0x14e   :  { %v1053_v4 = vadd.f32 %v1052_v3, %v1051_v1  ;;  %v1074_v5 = vpop.f32.mrb[5].mxu1  ;;  %v1054_v6 = vpop.f32.mrb[6].mxu0 }
 0x14f   :  { %v1075_v7 = vadd.f32 %v1074_v5, %v1073_v2  ;;  %v1076_v8 = vpop.f32.mrb[6].mxu1  ;;  %v1055_v9 = vpop.f32.mrb[7].mxu0 }
 0x150   :  { %v723_v10 = vadd.f32 %v1053_v4, %v682_v62  ;;  %v1056_v11 = vadd.f32 %v1055_v9, %v1054_v6  ;;  %v1077_v12 = vpop.f32.mrb[7].mxu1 }
 0x151   :  { %v1078_v13 = vadd.f32 %v1077_v12, %v1076_v8 }
 0x152   :  { %v764_v14 = vadd.f32 %v1075_v7, %v723_v10  ;;  %v726_v15 = vadd.f32 %v1056_v11, %v685_v0 }
 0x154   :  { %v770_v16 = vmax.f32 %v764_v14, 0.0  ;;  %v767_v17 = vadd.f32 %v1078_v13, %v726_v15 }
 0x156   :  { %v771_v18 = vmax.f32 %v767_v17, 0.0  ;;  %1129 = vmatprep.mubr.f32.mxu0 %v770_v16 }
 0x158   :  { %1130 = vmatmul.mubr.f32.vlgmr.msra.gmra.mrb[8].mxu0 %v771_v18 }
 0x22b   :  { %v1131_v20 = vpop.f32.mrb[8].mxu0 }
 0x22c   :  { %v861_v21 = vpop.f32.mrb[9].mxu0  ;;  %v867_v23 = vadd.f32 %v1131_v20, %v981_v19 }
 0x22d   :  { %v862_v22 = vadd.f32 %v981_v19, %v861_v21 }
 0x22f   :  { %870 = vmax.xlane.f32.xlu0 %v862_v22 }
 0x233   :  { %872 = vmax.xlane.f32.xlu0 %v867_v23 }
 0x2bc   :  { %v871_v24 = vpop.xlane.xlu0 %870 }
 0x2bd   :  { %v874_v25 = vsub.f32 %v862_v22, %v871_v24 }
 0x2bf   :  { %v876_v26 = vmul.f32 1.442695, %v874_v25 }
 0x2c0   :  { %v873_v27 = vpop.xlane.xlu0 %872 }
 0x2c1   :  { %1237 = vpow2.f32 %v876_v26  ;;  %v875_v28 = vsub.f32 %v867_v23, %v873_v27 }
 0x2c3   :  { %v878_v29 = vmul.f32 1.442695, %v875_v28 }
 0x2c5   :  { %1239 = vpow2.f32 %v878_v29 }
 0x2cb   :  { %v1238_v30 = vpop.eup %1237 }
 0x2cc   :  { %880 = vadd.xlane.f32.xlu1 %v1238_v30 }
 0x2cf   :  { %v1240_v31 = vpop.eup %1239 }
 0x2d0   :  { %882 = vadd.xlane.f32.xlu1 %v1240_v31 }
 0x359   :  { %v881_v32 = vpop.xlane.xlu1 %880 }
 0x35a   :  { %1241 = vrcp.f32 %v881_v32 }
 0x35d   :  { %v883_v33 = vpop.xlane.xlu1 %882 }
 0x35e   :  { %1243 = vrcp.f32 %v883_v33 }
 0x364   :  { %v1242_v34 = vpop.eup %1241 }
 0x365   :  { %v886_v36 = vmul.f32 %v1242_v34, %v1238_v30 }
 0x368   :  { %v1244_v35 = vpop.eup %1243 }
 0x369   :  { %v887_v37 = vmul.f32 %v1244_v35, %v1240_v31 }
 0x36b   :  { %v989_v38 = vpack.c.bf16 %v887_v37, %v886_v36 }
 0x36d   :  { %990 = vst [vmem:[#allocation8] sm:$0xff] %v989_v38  }
 0x36e   :  { %1322 = shalt.err (!%p1319_p0)
}
 0x36f   :  { %s1323_s15 = scalar_lea.hbm %s1444_s5, 128 }
 0x370   :  { %p1324_p1 = scmp.ne.s32.totalorder %s1444_s5, %s1323_s15  ;;  %p1327_p2 = scmp.lt.u32.totalorder %s1323_s15, %s1444_s5 }
 0x372   :  { %p1329_p3 = pnand %p1327_p2, %p1324_p1 }
 0x374   :  { %1332 = shalt.err (!%p1329_p3)
}
 0x375   :  { %909 = dma.vmem_to_hbm [thread:$0]  %s904_s11, 128, %s1444_s5, [#allocation4], %s1340_s28, %s1340_s28, %s1341_s29  }
 0x376   :  { %1337 = dma.done.wait [#allocation4], 128  }
 0x377   :  { %1338 = vsyncadd [#allocation4], 4294967168 }
 0x378   :  { %913 = vsyncpa [#allocation3], 1 }
 0x379   :  { %914 = vsyncpa [#allocation6], 1 }
 0x37a   :  { %915 = vsyncpa [#allocation4], 1 }

</bundles_post_ra>
